<compile_context>
chip_gen: v7x
topology: tpu7x:2x2x1
jax: 0.10.0
libtpu: 0.0.40
codegen_flags: <defaults>
</compile_context>

<pallas_src>
import functools

import jax
import jax.numpy as jnp
from jax.experimental import pallas as pl
from jax.experimental.pallas import tpu as pltpu


# ----------------------------- fused Pallas kernel --------------------------- #

def _temporal_block_kernel(x_ref, m1p_ref, b1p_ref, m2_ref, b2_ref,
                           rs_ref, ba_ref, o_ref, *, H, KH, lo):
    """One row block (TILE_B batch elements x H rows) per program.

    x_ref  : (TM, Cin*W)        bf16  input slab, rows=(b,h), cols=(c_in, w) (w fastest)
    m1p_ref: (Cin*W, 2*Cout*W)  bf16  [conv1 | 1x1 proj] banded operators, columns concatenated
    b1p_ref: (1, 2*Cout*W)      f32   [bias1 | bias_proj]
    m2_ref : (Cout*W, Cout*W)   bf16  conv2 banded operator
    b2_ref : (1, Cout*W)        f32
    rs_ref : (KH*Cout*W, Cout*W) bf16 stacked asset-conv channel-mix (row-blocked per tap)
    ba_ref : (1, Cout*W)        f32
    o_ref  : (TM, Cout*W)       f32   lane-dense output slab
    """
    tm = o_ref.shape[0]
    cw = o_ref.shape[1]

    x = x_ref[...]

    # conv1 pre-activation AND residual projection in one matmul (N = 2*Cout*W).
    y1p = jnp.dot(x, m1p_ref[...], preferred_element_type=jnp.float32) + b1p_ref[...]
    y1 = jnp.maximum(y1p[:, :cw], 0.0)          # conv1 + bias + relu
    proj = y1p[:, cw:]                          # 1x1 residual projection + bias

    # conv2 + bias + relu
    y2 = jnp.maximum(
        jnp.dot(y1.astype(jnp.bfloat16), m2_ref[...],
                preferred_element_type=jnp.float32) + b2_ref[...], 0.0)

    # Asset conv (kernel (H,1), padding 'same') as ONE matmul:
    #   out[h] = sum_kh A_kh . y2[h + kh - lo]
    # Build the shifted-and-stacked operand Z (TM, KH*Cout*W): per-tap sublane roll (XLU,
    # jnp.roll semantics) plus a zero mask for rows whose tap falls outside [0, H)
    # ('same' padding); the mask also kills any roll wrap-around across batch blocks.
    hmod = jax.lax.broadcasted_iota(jnp.int32, (tm, 1), 0) % H
    blocks = []
    for kh in range(KH):
        d = kh - lo                                   # row offset of this tap
        rolled = y2 if d == 0 else pltpu.roll(y2, shift=(-d) % tm, axis=0)
        valid = jnp.logical_and(hmod + d >= 0, hmod + d < H)
        blocks.append(jnp.where(valid, rolled, 0.0))
    z = jnp.concatenate(blocks, axis=1).astype(jnp.bfloat16)        # (TM, KH*Cout*W)
    y3 = jnp.maximum(
        jnp.dot(z, rs_ref[...], preferred_element_type=jnp.float32) + ba_ref[...], 0.0)

    # residual add + relu
    o_ref[...] = jnp.maximum(proj + y3, 0.0)


# ----------------------- weight -> operator-matrix lowering ------------------ #

def _same_pads(k, d):
    """PyTorch Conv2d(padding='same') split: low = total//2, high = total - low."""
    total = d * (k - 1)
    lo = total // 2
    return lo, total - lo


def _wconv_band_matrix(w_oihw, W, dil_w):
    """(1, KW)-kernel conv along W with 'same' padding as a (Cin*W, Cout*W) banded matrix."""
    Cout, Cin, KH, KW = w_oihw.shape
    if KH != 1:
        # TODO(synk): only (1, KW) kernels are lowered; kernel_size[0] > 1 along H unsupported.
        raise NotImplementedError("only (1, KW) kernels are supported for conv1/conv2")
    lo, _ = _same_pads(KW, dil_w)
    wi = jnp.arange(W)
    M = jnp.zeros((Cin, W, Cout, W), jnp.float32)
    for t in range(KW):
        off = t * dil_w - lo
        # sel[w_in, w_out] = 1 iff w_in == w_out + off (out-of-range taps drop out => zero pad)
        sel = (wi[:, None] == wi[None, :] + off).astype(jnp.float32)
        M = M + jnp.einsum('oi,ab->iaob', w_oihw[:, :, 0, t], sel)
    return M.reshape(Cin * W, Cout * W)


def _pointwise_matrix(w_oihw, W):
    """1x1 conv as a (Cin*W, Cout*W) matrix: wp^T kron I_W."""
    Cout, Cin = w_oihw.shape[0], w_oihw.shape[1]
    eye_w = jnp.eye(W, dtype=jnp.float32)
    return jnp.einsum('oi,ab->iaob', w_oihw[:, :, 0, 0], eye_w).reshape(Cin * W, Cout * W)


def _asset_stacked_matrix(wa_oihw, W):
    """(KH,1)-kernel asset conv: per-tap channel-mix matrices stacked on rows."""
    C, Ci, KH, KW = wa_oihw.shape
    assert C == Ci and KW == 1
    eye_w = jnp.eye(W, dtype=jnp.float32)
    blocks = [jnp.einsum('oi,ab->iaob', wa_oihw[:, :, kh, 0], eye_w).reshape(C * W, C * W)
              for kh in range(KH)]
    return jnp.concatenate(blocks, axis=0)                          # (KH*C*W, C*W)


def _bias_row(b, W):
    """bias (C,) -> (1, C*W) row matching column order (c, w) with w fastest."""
    return jnp.repeat(b.astype(jnp.float32), W).reshape(1, -1)


def lower_temporal_block_params(params, W, dilation):
    """Precompute the lane-dense operator matrices ONCE per parameter set.

    Hoisted out of the per-call forward path (they depend only on the weights)."""
    dil_w = dilation[1]
    # TODO(synk): dilation[0] along H is assumed 1 (kernels here are (1, KW)).
    m1 = _wconv_band_matrix(params["w1"], W, dil_w)
    m2 = _wconv_band_matrix(params["w2"], W, dil_w)
    mp = _pointwise_matrix(params["wp"], W)
    rs = _asset_stacked_matrix(params["wa"], W)
    bf = jnp.bfloat16
    return {
        "m1p": jnp.concatenate([m1, mp], axis=1).astype(bf),        # (Cin*W, 2*Cout*W)
        "b1p": jnp.concatenate([_bias_row(params["b1"], W),
                                _bias_row(params["bp"], W)], axis=1),
        "m2": m2.astype(bf),                                        # (Cout*W, Cout*W)
        "b2": _bias_row(params["b2"], W),
        "rs": rs.astype(bf),                                        # (KH*Cout*W, Cout*W)
        "ba": _bias_row(params["ba"], W),
    }


# ------------------------------- forward wrapper ----------------------------- #

def _invariant_spec(shape):
    return pl.BlockSpec(shape, lambda i: (0,) * len(shape))


def temporal_block_forward(x_nchw, ops):
    """Forward pass of TemporalBlock.  x_nchw: (B, Cin, H, W) float32 (PyTorch NCHW)."""
    B, Cin, H, W = x_nchw.shape
    cw_in = Cin * W
    cw_out = ops["m2"].shape[0]
    Cout = cw_out // W
    KH = ops["rs"].shape[0] // cw_out
    lo = (KH - 1) // 2          # asset conv 'same' left pad (dilation 1)

    # Lane-dense layout: rows = (b, h), cols = (channel, w) with w fastest.
    # TODO(synk): in a full TCN stack, keep activations in this slab layout between blocks to
    # avoid the NCHW <-> slab transposes (two HBM round trips) on every layer.
    x2d = jnp.transpose(x_nchw, (0, 2, 1, 3)).reshape(B * H, cw_in).astype(jnp.bfloat16)

    # Fold as many batch elements per program as fit a ~256-row MXU tile.  Tiles are
    # batch-aligned so asset-conv row shifts never cross a batch boundary.
    # (On v7x one may prefer >= 2 programs to feed both TensorCores; v5e/v6e prefer fewer.)
    tile_b = max(1, min(B, max(1, 256 // H)))
    while B % tile_b:
        tile_b -= 1
    tile_m = tile_b * H
    grid = (B // tile_b,)

    kernel = functools.partial(_temporal_block_kernel, H=H, KH=KH, lo=lo)
    out2d = pl.pallas_call(
        kernel,
        out_shape=jax.ShapeDtypeStruct((B * H, cw_out), jnp.float32),
        grid=grid,
        in_specs=[
            pl.BlockSpec((tile_m, cw_in), lambda i: (i, 0)),   # per-tile input slab
            _invariant_spec(ops["m1p"].shape),                 # [conv1 | proj] operator
            _invariant_spec(ops["b1p"].shape),                 # [bias1 | bias_proj]
            _invariant_spec(ops["m2"].shape),                  # conv2 operator
            _invariant_spec(ops["b2"].shape),                  # bias2
            _invariant_spec(ops["rs"].shape),                  # stacked asset-conv operator
            _invariant_spec(ops["ba"].shape),                  # asset bias
        ],
        out_specs=pl.BlockSpec((tile_m, cw_out), lambda i: (i, 0)),
        compiler_params=pltpu.CompilerParams(dimension_semantics=("parallel",)),
    )(x2d, ops["m1p"], ops["b1p"], ops["m2"], ops["b2"], ops["rs"], ops["ba"])

    return jnp.transpose(out2d.reshape(B, H, Cout, W), (0, 2, 1, 3))   # back to NCHW


# --------------------------- pure-JAX reference ------------------------------ #

def _conv_same_ref(x_nchw, w_oihw, b, dilation):
    kh, kw = w_oihw.shape[2], w_oihw.shape[3]
    dh, dw = dilation
    pad = (_same_pads(kh, dh), _same_pads(kw, dw))
    y = jax.lax.conv_general_dilated(
        x_nchw, w_oihw, window_strides=(1, 1), padding=pad,
        rhs_dilation=(dh, dw), dimension_numbers=("NCHW", "OIHW", "NCHW"),
        precision=jax.lax.Precision.HIGHEST,
    )
    return y + b.reshape(1, -1, 1, 1)


def temporal_block_ref(x, params, dilation):
    y = jax.nn.relu(_conv_same_ref(x, params["w1"], params["b1"], dilation))
    y = jax.nn.relu(_conv_same_ref(y, params["w2"], params["b2"], dilation))
    y = jax.nn.relu(_conv_same_ref(y, params["wa"], params["ba"], (1, 1)))
    p = _conv_same_ref(x, params["wp"], params["bp"], (1, 1))
    return jax.nn.relu(p + y)


# --------------------------------- main -------------------------------------- #

if __name__ == "__main__":
    key = jax.random.PRNGKey(0)
    ks = jax.random.split(key, 6)

    # TemporalBlock(n_inputs=4, n_outputs=8, kernel_size=(1, 3), dilation=(1, 2), dropout=0.1)
    B, Cin, Cout, H, W = 2, 4, 8, 8, 16          # NCHW input: (2, 4, 8, 16)
    kernel_size = (1, 3)
    dilation = (1, 2)

    x = jax.random.normal(ks[0], (B, Cin, H, W), dtype=jnp.float32)

    # Deterministic parameter init mirroring the module's __init__: normal(std=0.01), zero bias.
    params = {
        "w1": 0.01 * jax.random.normal(ks[1], (Cout, Cin) + kernel_size, jnp.float32),
        "b1": jnp.zeros((Cout,), jnp.float32),
        "w2": 0.01 * jax.random.normal(ks[2], (Cout, Cout) + kernel_size, jnp.float32),
        "b2": jnp.zeros((Cout,), jnp.float32),
        "wa": 0.01 * jax.random.normal(ks[3], (Cout, Cout, H, 1), jnp.float32),  # lazy asset_conv (H,1)
        "ba": jnp.zeros((Cout,), jnp.float32),
        "wp": 0.01 * jax.random.normal(ks[4], (Cout, Cin, 1, 1), jnp.float32),   # proj (1x1)
        "bp": jnp.zeros((Cout,), jnp.float32),
    }

    # Operator lowering runs ONCE per parameter set (hoisted out of the per-call path).
    ops = lower_temporal_block_params(params, W, dilation)

    fwd = jax.jit(temporal_block_forward)
    out = fwd(x, ops)
    jax.block_until_ready(out)
    assert out.shape == (B, Cout, H, W), out.shape

    ref = temporal_block_ref(x, params, dilation)
    err = float(jnp.max(jnp.abs(out - ref)))
    # Kernel uses bf16 operands with f32 accumulation (same numerics as DEFAULT MXU precision on
    # f32 inputs) vs a HIGHEST-precision XLA reference; 2e-3 abs slack covers that rounding
    # while still catching layout/index bugs.
    if err > 2e-3:
        raise AssertionError(f"mismatch vs XLA reference: max abs err = {err}")

    print("KERNEL_OK")
</pallas_src>

<mosaic_0001>
module attributes {stable_mosaic.version = 11 : i64} {
  func.func @_temporal_block_kernel(%arg0: i32, %arg1: memref<16x64xbf16, #tpu.memory_space<vmem>>, %arg2: memref<64x256xbf16, #tpu.memory_space<vmem>>, %arg3: memref<1x256xf32, #tpu.memory_space<vmem>>, %arg4: memref<128x128xbf16, #tpu.memory_space<vmem>>, %arg5: memref<1x128xf32, #tpu.memory_space<vmem>>, %arg6: memref<1024x128xbf16, #tpu.memory_space<vmem>>, %arg7: memref<1x128xf32, #tpu.memory_space<vmem>>, %arg8: memref<16x128xf32, #tpu.memory_space<vmem>>) attributes {dimension_semantics = [#tpu.dimension_semantics<parallel>], iteration_bounds = array<i64: 1>, scalar_prefetch = 0 : i64, scratch_operands = 0 : i64, tpu.core_type = #tpu.core_type<tc>, window_params = [{transform_indices = @transform_0, window_bounds = array<i64: 16, 64>}, {pipeline_mode = #tpu.pipeline_mode<synchronous>, transform_indices = @transform_1, window_bounds = array<i64: 64, 256>}, {pipeline_mode = #tpu.pipeline_mode<synchronous>, transform_indices = @transform_2, window_bounds = array<i64: 1, 256>}, {pipeline_mode = #tpu.pipeline_mode<synchronous>, transform_indices = @transform_3, window_bounds = array<i64: 128, 128>}, {pipeline_mode = #tpu.pipeline_mode<synchronous>, transform_indices = @transform_4, window_bounds = array<i64: 1, 128>}, {pipeline_mode = #tpu.pipeline_mode<synchronous>, transform_indices = @transform_5, window_bounds = array<i64: 1024, 128>}, {pipeline_mode = #tpu.pipeline_mode<synchronous>, transform_indices = @transform_6, window_bounds = array<i64: 1, 128>}, {transform_indices = @transform_7, window_bounds = array<i64: 16, 128>}]} {
    %c0 = arith.constant 0 : index
    %c0_0 = arith.constant 0 : index
    %0 = vector.load %arg1[%c0, %c0_0] : memref<16x64xbf16, #tpu.memory_space<vmem>>, vector<16x64xbf16>
    %c0_1 = arith.constant 0 : index
    %c0_2 = arith.constant 0 : index
    %1 = vector.load %arg2[%c0_1, %c0_2] : memref<64x256xbf16, #tpu.memory_space<vmem>>, vector<64x256xbf16>
    %cst = arith.constant dense<0.000000e+00> : vector<16x256xf32>
    %2 = tpu.matmul %0, %1, %cst {dimension_numbers = #tpu.dot_dimension_numbers<[1], [0], [0], [1], [0, 0, 1, 1], [], []>} : vector<16x64xbf16>, vector<64x256xbf16>, vector<16x256xf32> -> vector<16x256xf32>
    %c0_3 = arith.constant 0 : index
    %c0_4 = arith.constant 0 : index
    %3 = vector.load %arg3[%c0_3, %c0_4] : memref<1x256xf32, #tpu.memory_space<vmem>>, vector<1x256xf32>
    %4 = vector.broadcast %3 : vector<1x256xf32> to vector<16x256xf32>
    %5 = arith.addf %2, %4 : vector<16x256xf32>
    %6 = vector.extract_strided_slice %5 {offsets = [0, 0], sizes = [16, 128], strides = [1, 1]} : vector<16x256xf32> to vector<16x128xf32>
    %cst_5 = arith.constant 0.000000e+00 : f32
    %7 = vector.broadcast %cst_5 : f32 to vector<16x128xf32>
    %8 = arith.maximumf %6, %7 : vector<16x128xf32>
    %9 = vector.extract_strided_slice %5 {offsets = [0, 128], sizes = [16, 128], strides = [1, 1]} : vector<16x256xf32> to vector<16x128xf32>
    %10 = arith.truncf %8 : vector<16x128xf32> to vector<16x128xbf16>
    %c0_6 = arith.constant 0 : index
    %c0_7 = arith.constant 0 : index
    %11 = vector.load %arg4[%c0_6, %c0_7] : memref<128x128xbf16, #tpu.memory_space<vmem>>, vector<128x128xbf16>
    %cst_8 = arith.constant dense<0.000000e+00> : vector<16x128xf32>
    %12 = tpu.matmul %10, %11, %cst_8 {dimension_numbers = #tpu.dot_dimension_numbers<[1], [0], [0], [1], [0, 0, 1, 1], [], []>} : vector<16x128xbf16>, vector<128x128xbf16>, vector<16x128xf32> -> vector<16x128xf32>
    %c0_9 = arith.constant 0 : index
    %c0_10 = arith.constant 0 : index
    %13 = vector.load %arg5[%c0_9, %c0_10] : memref<1x128xf32, #tpu.memory_space<vmem>>, vector<1x128xf32>
    %14 = vector.broadcast %13 : vector<1x128xf32> to vector<16x128xf32>
    %15 = arith.addf %12, %14 : vector<16x128xf32>
    %cst_11 = arith.constant 0.000000e+00 : f32
    %16 = vector.broadcast %cst_11 : f32 to vector<16x128xf32>
    %17 = arith.maximumf %15, %16 : vector<16x128xf32>
    %18 = tpu.iota {dimensions = array<i32: 0>} : vector<16x1xi32>
    %c8_i32 = arith.constant 8 : i32
    %c0_i32 = arith.constant 0 : i32
    %19 = arith.cmpi eq, %c8_i32, %c0_i32 : i32
    %c1_i32 = arith.constant 1 : i32
    %20 = arith.select %19, %c1_i32, %c8_i32 : i32
    %21 = vector.broadcast %20 : i32 to vector<16x1xi32>
    %22 = arith.remsi %18, %21 : vector<16x1xi32>
    %c0_i32_12 = arith.constant 0 : i32
    %23 = vector.broadcast %c0_i32_12 : i32 to vector<16x1xi32>
    %24 = arith.cmpi ne, %22, %23 : vector<16x1xi32>
    %c0_i32_13 = arith.constant 0 : i32
    %25 = vector.broadcast %c0_i32_13 : i32 to vector<16x1xi32>
    %26 = arith.cmpi slt, %22, %25 : vector<16x1xi32>
    %c0_i32_14 = arith.constant 0 : i32
    %27 = arith.cmpi slt, %20, %c0_i32_14 : i32
    %28 = vector.broadcast %27 : i1 to vector<16x1xi1>
    %29 = vector.broadcast %28 : vector<16x1xi1> to vector<16x1xi1>
    %30 = arith.xori %26, %29 : vector<16x1xi1>
    %31 = arith.andi %30, %24 : vector<16x1xi1>
    %32 = vector.broadcast %20 : i32 to vector<16x1xi32>
    %33 = arith.addi %22, %32 : vector<16x1xi32>
    %34 = arith.select %31, %33, %22 : vector<16x1xi1>, vector<16x1xi32>
    %c3_i32 = arith.constant 3 : i32
    %35 = tpu.dynamic_rotate %17 by %c3_i32 dim 0 : vector<16x128xf32>, i32 -> vector<16x128xf32>
    %c-3_i32 = arith.constant -3 : i32
    %36 = vector.broadcast %c-3_i32 : i32 to vector<16x1xi32>
    %37 = arith.addi %34, %36 : vector<16x1xi32>
    %c0_i32_15 = arith.constant 0 : i32
    %38 = vector.broadcast %c0_i32_15 : i32 to vector<16x1xi32>
    %39 = arith.cmpi sge, %37, %38 : vector<16x1xi32>
    %c-3_i32_16 = arith.constant -3 : i32
    %40 = vector.broadcast %c-3_i32_16 : i32 to vector<16x1xi32>
    %41 = arith.addi %34, %40 : vector<16x1xi32>
    %c8_i32_17 = arith.constant 8 : i32
    %42 = vector.broadcast %c8_i32_17 : i32 to vector<16x1xi32>
    %43 = arith.cmpi slt, %41, %42 : vector<16x1xi32>
    %44 = arith.andi %39, %43 : vector<16x1xi1>
    %cst_18 = arith.constant 0.000000e+00 : f32
    %45 = vector.shape_cast %44 : vector<16x1xi1> to vector<16x1xi1>
    %46 = vector.broadcast %45 : vector<16x1xi1> to vector<16x128xi1>
    %47 = vector.broadcast %cst_18 : f32 to vector<16x128xf32>
    %48 = arith.select %46, %35, %47 : vector<16x128xi1>, vector<16x128xf32>
    %c2_i32 = arith.constant 2 : i32
    %49 = tpu.dynamic_rotate %17 by %c2_i32 dim 0 : vector<16x128xf32>, i32 -> vector<16x128xf32>
    %c-2_i32 = arith.constant -2 : i32
    %50 = vector.broadcast %c-2_i32 : i32 to vector<16x1xi32>
    %51 = arith.addi %34, %50 : vector<16x1xi32>
    %c0_i32_19 = arith.constant 0 : i32
    %52 = vector.broadcast %c0_i32_19 : i32 to vector<16x1xi32>
    %53 = arith.cmpi sge, %51, %52 : vector<16x1xi32>
    %c-2_i32_20 = arith.constant -2 : i32
    %54 = vector.broadcast %c-2_i32_20 : i32 to vector<16x1xi32>
    %55 = arith.addi %34, %54 : vector<16x1xi32>
    %c8_i32_21 = arith.constant 8 : i32
    %56 = vector.broadcast %c8_i32_21 : i32 to vector<16x1xi32>
    %57 = arith.cmpi slt, %55, %56 : vector<16x1xi32>
    %58 = arith.andi %53, %57 : vector<16x1xi1>
    %cst_22 = arith.constant 0.000000e+00 : f32
    %59 = vector.shape_cast %58 : vector<16x1xi1> to vector<16x1xi1>
    %60 = vector.broadcast %59 : vector<16x1xi1> to vector<16x128xi1>
    %61 = vector.broadcast %cst_22 : f32 to vector<16x128xf32>
    %62 = arith.select %60, %49, %61 : vector<16x128xi1>, vector<16x128xf32>
    %c1_i32_23 = arith.constant 1 : i32
    %63 = tpu.dynamic_rotate %17 by %c1_i32_23 dim 0 : vector<16x128xf32>, i32 -> vector<16x128xf32>
    %c-1_i32 = arith.constant -1 : i32
    %64 = vector.broadcast %c-1_i32 : i32 to vector<16x1xi32>
    %65 = arith.addi %34, %64 : vector<16x1xi32>
    %c0_i32_24 = arith.constant 0 : i32
    %66 = vector.broadcast %c0_i32_24 : i32 to vector<16x1xi32>
    %67 = arith.cmpi sge, %65, %66 : vector<16x1xi32>
    %c-1_i32_25 = arith.constant -1 : i32
    %68 = vector.broadcast %c-1_i32_25 : i32 to vector<16x1xi32>
    %69 = arith.addi %34, %68 : vector<16x1xi32>
    %c8_i32_26 = arith.constant 8 : i32
    %70 = vector.broadcast %c8_i32_26 : i32 to vector<16x1xi32>
    %71 = arith.cmpi slt, %69, %70 : vector<16x1xi32>
    %72 = arith.andi %67, %71 : vector<16x1xi1>
    %cst_27 = arith.constant 0.000000e+00 : f32
    %73 = vector.shape_cast %72 : vector<16x1xi1> to vector<16x1xi1>
    %74 = vector.broadcast %73 : vector<16x1xi1> to vector<16x128xi1>
    %75 = vector.broadcast %cst_27 : f32 to vector<16x128xf32>
    %76 = arith.select %74, %63, %75 : vector<16x128xi1>, vector<16x128xf32>
    %c0_i32_28 = arith.constant 0 : i32
    %77 = vector.broadcast %c0_i32_28 : i32 to vector<16x1xi32>
    %78 = arith.addi %34, %77 : vector<16x1xi32>
    %c0_i32_29 = arith.constant 0 : i32
    %79 = vector.broadcast %c0_i32_29 : i32 to vector<16x1xi32>
    %80 = arith.cmpi sge, %78, %79 : vector<16x1xi32>
    %c0_i32_30 = arith.constant 0 : i32
    %81 = vector.broadcast %c0_i32_30 : i32 to vector<16x1xi32>
    %82 = arith.addi %34, %81 : vector<16x1xi32>
    %c8_i32_31 = arith.constant 8 : i32
    %83 = vector.broadcast %c8_i32_31 : i32 to vector<16x1xi32>
    %84 = arith.cmpi slt, %82, %83 : vector<16x1xi32>
    %85 = arith.andi %80, %84 : vector<16x1xi1>
    %cst_32 = arith.constant 0.000000e+00 : f32
    %86 = vector.shape_cast %85 : vector<16x1xi1> to vector<16x1xi1>
    %87 = vector.broadcast %86 : vector<16x1xi1> to vector<16x128xi1>
    %88 = vector.broadcast %cst_32 : f32 to vector<16x128xf32>
    %89 = arith.select %87, %17, %88 : vector<16x128xi1>, vector<16x128xf32>
    %c15_i32 = arith.constant 15 : i32
    %90 = tpu.dynamic_rotate %17 by %c15_i32 dim 0 : vector<16x128xf32>, i32 -> vector<16x128xf32>
    %c1_i32_33 = arith.constant 1 : i32
    %91 = vector.broadcast %c1_i32_33 : i32 to vector<16x1xi32>
    %92 = arith.addi %34, %91 : vector<16x1xi32>
    %c0_i32_34 = arith.constant 0 : i32
    %93 = vector.broadcast %c0_i32_34 : i32 to vector<16x1xi32>
    %94 = arith.cmpi sge, %92, %93 : vector<16x1xi32>
    %c1_i32_35 = arith.constant 1 : i32
    %95 = vector.broadcast %c1_i32_35 : i32 to vector<16x1xi32>
    %96 = arith.addi %34, %95 : vector<16x1xi32>
    %c8_i32_36 = arith.constant 8 : i32
    %97 = vector.broadcast %c8_i32_36 : i32 to vector<16x1xi32>
    %98 = arith.cmpi slt, %96, %97 : vector<16x1xi32>
    %99 = arith.andi %94, %98 : vector<16x1xi1>
    %cst_37 = arith.constant 0.000000e+00 : f32
    %100 = vector.shape_cast %99 : vector<16x1xi1> to vector<16x1xi1>
    %101 = vector.broadcast %100 : vector<16x1xi1> to vector<16x128xi1>
    %102 = vector.broadcast %cst_37 : f32 to vector<16x128xf32>
    %103 = arith.select %101, %90, %102 : vector<16x128xi1>, vector<16x128xf32>
    %c14_i32 = arith.constant 14 : i32
    %104 = tpu.dynamic_rotate %17 by %c14_i32 dim 0 : vector<16x128xf32>, i32 -> vector<16x128xf32>
    %c2_i32_38 = arith.constant 2 : i32
    %105 = vector.broadcast %c2_i32_38 : i32 to vector<16x1xi32>
    %106 = arith.addi %34, %105 : vector<16x1xi32>
    %c0_i32_39 = arith.constant 0 : i32
    %107 = vector.broadcast %c0_i32_39 : i32 to vector<16x1xi32>
    %108 = arith.cmpi sge, %106, %107 : vector<16x1xi32>
    %c2_i32_40 = arith.constant 2 : i32
    %109 = vector.broadcast %c2_i32_40 : i32 to vector<16x1xi32>
    %110 = arith.addi %34, %109 : vector<16x1xi32>
    %c8_i32_41 = arith.constant 8 : i32
    %111 = vector.broadcast %c8_i32_41 : i32 to vector<16x1xi32>
    %112 = arith.cmpi slt, %110, %111 : vector<16x1xi32>
    %113 = arith.andi %108, %112 : vector<16x1xi1>
    %cst_42 = arith.constant 0.000000e+00 : f32
    %114 = vector.shape_cast %113 : vector<16x1xi1> to vector<16x1xi1>
    %115 = vector.broadcast %114 : vector<16x1xi1> to vector<16x128xi1>
    %116 = vector.broadcast %cst_42 : f32 to vector<16x128xf32>
    %117 = arith.select %115, %104, %116 : vector<16x128xi1>, vector<16x128xf32>
    %c13_i32 = arith.constant 13 : i32
    %118 = tpu.dynamic_rotate %17 by %c13_i32 dim 0 : vector<16x128xf32>, i32 -> vector<16x128xf32>
    %c3_i32_43 = arith.constant 3 : i32
    %119 = vector.broadcast %c3_i32_43 : i32 to vector<16x1xi32>
    %120 = arith.addi %34, %119 : vector<16x1xi32>
    %c0_i32_44 = arith.constant 0 : i32
    %121 = vector.broadcast %c0_i32_44 : i32 to vector<16x1xi32>
    %122 = arith.cmpi sge, %120, %121 : vector<16x1xi32>
    %c3_i32_45 = arith.constant 3 : i32
    %123 = vector.broadcast %c3_i32_45 : i32 to vector<16x1xi32>
    %124 = arith.addi %34, %123 : vector<16x1xi32>
    %c8_i32_46 = arith.constant 8 : i32
    %125 = vector.broadcast %c8_i32_46 : i32 to vector<16x1xi32>
    %126 = arith.cmpi slt, %124, %125 : vector<16x1xi32>
    %127 = arith.andi %122, %126 : vector<16x1xi1>
    %cst_47 = arith.constant 0.000000e+00 : f32
    %128 = vector.shape_cast %127 : vector<16x1xi1> to vector<16x1xi1>
    %129 = vector.broadcast %128 : vector<16x1xi1> to vector<16x128xi1>
    %130 = vector.broadcast %cst_47 : f32 to vector<16x128xf32>
    %131 = arith.select %129, %118, %130 : vector<16x128xi1>, vector<16x128xf32>
    %c12_i32 = arith.constant 12 : i32
    %132 = tpu.dynamic_rotate %17 by %c12_i32 dim 0 : vector<16x128xf32>, i32 -> vector<16x128xf32>
    %c4_i32 = arith.constant 4 : i32
    %133 = vector.broadcast %c4_i32 : i32 to vector<16x1xi32>
    %134 = arith.addi %34, %133 : vector<16x1xi32>
    %c0_i32_48 = arith.constant 0 : i32
    %135 = vector.broadcast %c0_i32_48 : i32 to vector<16x1xi32>
    %136 = arith.cmpi sge, %134, %135 : vector<16x1xi32>
    %c4_i32_49 = arith.constant 4 : i32
    %137 = vector.broadcast %c4_i32_49 : i32 to vector<16x1xi32>
    %138 = arith.addi %34, %137 : vector<16x1xi32>
    %c8_i32_50 = arith.constant 8 : i32
    %139 = vector.broadcast %c8_i32_50 : i32 to vector<16x1xi32>
    %140 = arith.cmpi slt, %138, %139 : vector<16x1xi32>
    %141 = arith.andi %136, %140 : vector<16x1xi1>
    %cst_51 = arith.constant 0.000000e+00 : f32
    %142 = vector.shape_cast %141 : vector<16x1xi1> to vector<16x1xi1>
    %143 = vector.broadcast %142 : vector<16x1xi1> to vector<16x128xi1>
    %144 = vector.broadcast %cst_51 : f32 to vector<16x128xf32>
    %145 = arith.select %143, %132, %144 : vector<16x128xi1>, vector<16x128xf32>
    %146 = tpu.concatenate %48, %62, %76, %89, %103, %117, %131, %145 in 1 : vector<16x128xf32>, vector<16x128xf32>, vector<16x128xf32>, vector<16x128xf32>, vector<16x128xf32>, vector<16x128xf32>, vector<16x128xf32>, vector<16x128xf32> -> vector<16x1024xf32>
    %147 = arith.truncf %146 : vector<16x1024xf32> to vector<16x1024xbf16>
    %c0_52 = arith.constant 0 : index
    %c0_53 = arith.constant 0 : index
    %148 = vector.load %arg6[%c0_52, %c0_53] : memref<1024x128xbf16, #tpu.memory_space<vmem>>, vector<1024x128xbf16>
    %cst_54 = arith.constant dense<0.000000e+00> : vector<16x128xf32>
    %149 = tpu.matmul %147, %148, %cst_54 {dimension_numbers = #tpu.dot_dimension_numbers<[1], [0], [0], [1], [0, 0, 1, 1], [], []>} : vector<16x1024xbf16>, vector<1024x128xbf16>, vector<16x128xf32> -> vector<16x128xf32>
    %c0_55 = arith.constant 0 : index
    %c0_56 = arith.constant 0 : index
    %150 = vector.load %arg7[%c0_55, %c0_56] : memref<1x128xf32, #tpu.memory_space<vmem>>, vector<1x128xf32>
    %151 = vector.broadcast %150 : vector<1x128xf32> to vector<16x128xf32>
    %152 = arith.addf %149, %151 : vector<16x128xf32>
    %cst_57 = arith.constant 0.000000e+00 : f32
    %153 = vector.broadcast %cst_57 : f32 to vector<16x128xf32>
    %154 = arith.maximumf %152, %153 : vector<16x128xf32>
    %155 = arith.addf %9, %154 : vector<16x128xf32>
    %cst_58 = arith.constant 0.000000e+00 : f32
    %156 = vector.broadcast %cst_58 : f32 to vector<16x128xf32>
    %157 = arith.maximumf %155, %156 : vector<16x128xf32>
    %c0_59 = arith.constant 0 : index
    %c0_60 = arith.constant 0 : index
    %158 = vector.load %arg8[%c0_59, %c0_60] : memref<16x128xf32, #tpu.memory_space<vmem>>, vector<16x128xf32>
    tpu.vector_store %arg8[%c0_59, %c0_60], %157 {strides = array<i32>} : memref<16x128xf32, #tpu.memory_space<vmem>>, vector<16x128xf32>,
    return
  }
  func.func @transform_0(%arg0: i32) -> (i32, i32) {
    %c0_i32 = arith.constant 0 : i32
    %c0_i32_0 = arith.constant 0 : i32
    return %arg0, %c0_i32 : i32, i32
  }
  func.func @transform_1(%arg0: i32) -> (i32, i32) {
    %c0_i32 = arith.constant 0 : i32
    %c0_i32_0 = arith.constant 0 : i32
    %c0_i32_1 = arith.constant 0 : i32
    return %c0_i32, %c0_i32_0 : i32, i32
  }
  func.func @transform_2(%arg0: i32) -> (i32, i32) {
    %c0_i32 = arith.constant 0 : i32
    %c0_i32_0 = arith.constant 0 : i32
    %c0_i32_1 = arith.constant 0 : i32
    return %c0_i32, %c0_i32_0 : i32, i32
  }
  func.func @transform_3(%arg0: i32) -> (i32, i32) {
    %c0_i32 = arith.constant 0 : i32
    %c0_i32_0 = arith.constant 0 : i32
    %c0_i32_1 = arith.constant 0 : i32
    return %c0_i32, %c0_i32_0 : i32, i32
  }
  func.func @transform_4(%arg0: i32) -> (i32, i32) {
    %c0_i32 = arith.constant 0 : i32
    %c0_i32_0 = arith.constant 0 : i32
    %c0_i32_1 = arith.constant 0 : i32
    return %c0_i32, %c0_i32_0 : i32, i32
  }
  func.func @transform_5(%arg0: i32) -> (i32, i32) {
    %c0_i32 = arith.constant 0 : i32
    %c0_i32_0 = arith.constant 0 : i32
    %c0_i32_1 = arith.constant 0 : i32
    return %c0_i32, %c0_i32_0 : i32, i32
  }
  func.func @transform_6(%arg0: i32) -> (i32, i32) {
    %c0_i32 = arith.constant 0 : i32
    %c0_i32_0 = arith.constant 0 : i32
    %c0_i32_1 = arith.constant 0 : i32
    return %c0_i32, %c0_i32_0 : i32, i32
  }
  func.func @transform_7(%arg0: i32) -> (i32, i32) {
    %c0_i32 = arith.constant 0 : i32
    %c0_i32_0 = arith.constant 0 : i32
    return %arg0, %c0_i32 : i32, i32
  }
}

</mosaic_0001>

<bundles_post_ra>
// kernel: temporal_block_forward.1
= control target key start
LH: loop header
LB: loop body
LE: loop exit
PB: predicated region body
PF: predicated region fallthrough
CT: control target
= control target key end

     0   :  { %12 = vsyncpa [#allocation3], 0  ;;  %s1485_s24 = smov [#allocation2]   ;;  %s1731_s0 = inlined_call_operand.vmem [shape: bf16[16,64], index: 0, kind: input, shape index: {}]   ;;  %s1732_s1 = inlined_call_operand.vmem [shape: bf16[64,256], index: 1, kind: input, shape index: {}]   ;;  %s1733_s2 = inlined_call_operand.vmem [shape: f32[1,256], index: 2, kind: input, shape index: {}]   ;;  %s1734_s3 = inlined_call_operand.vmem [shape: bf16[128,128], index: 3, kind: input, shape index: {}]   ;;  %s1735_s4 = inlined_call_operand.vmem [shape: f32[1,128], index: 4, kind: input, shape index: {}]   ;;  %s1736_s5 = inlined_call_operand.hbm [shape: bf16[1024,128], index: 5, kind: input, shape index: {}]   ;;  %s1737_s6 = inlined_call_operand.vmem [shape: f32[1,128], index: 6, kind: input, shape index: {}]   ;;  %s1738_s7 = inlined_call_operand.vmem [shape: f32[16,128], index: 7, kind: output, shape index: {}]  }
   0x1   :  { %s28_s25 = sshll.u32 %s1485_s24, 4  ;;  %s1461_s28 = scalar_lea.hbm %s1736_s5, 8192  ;;  %s29_s25 = int_to_ptr.vmem [resolvable:$true] %s28_s25 }
   0x2   :  { %p1462_p0 = scmp.ne.s32.totalorder %s1736_s5, %s1461_s28  ;;  %p1465_p1 = scmp.lt.u32.totalorder %s1461_s28, %s1736_s5 }
   0x4   :  { %p1467_p2 = pnand %p1465_p1, %p1462_p0 }
   0x6   :  { %1470 = shalt.err (!%p1467_p2)
}
   0x7   :  { %s1471_s10 = scalar_lea.vmem %s29_s25, 8192  ;;  %p1476_p4 = scmp.lt.s32.totalorder %s29_s25, %s29_s25 }
   0x8   :  { %p1472_p3 = scmp.ne.s32.totalorder %s29_s25, %s1471_s10  ;;  %p1477_p5 = scmp.lt.s32.totalorder %s1471_s10, %s1471_s10 }
   0xa   :  { %p1478_p6 = por %p1477_p5, %p1476_p4 }
   0xc   :  { %p1479_p7 = pnand %p1478_p6, %p1472_p3 }
   0xe   :  { %1482 = shalt.err (!%p1479_p7)
}
   0xf   :  { %s1486_s11 = smov 64   ;;  %s1487_s12 = smov 4  }
  0x10   :  { %34 = dma.hbm_to_vmem [thread:$0]  %s1736_s5, 8192, %s29_s25, [#allocation3], %s1486_s11, %s1486_s11, %s1487_s12  }
  0x11   :  { %1483 = dma.done.wait [#allocation3], 8192  }
  0x12   :  { %1484 = vsyncadd [#allocation3], 4294959104  ;;  %v1488_v0 = vmov 0   ;;  %v1489_v1 = vmov 0.0   ;;  %v1376_v2 = vld [vmem:[%s1732_s1 + $0x4] ss:$8 sps:$4 sm:$0xff]   ;;  %v53_v30 = vlaneseq }
  0x13   :  { %144 = vmatprep.mubr.bf16.mxu0 %v1488_v0  ;;  %1350 = vmatprep.subr.bf16.mxu1 %v1489_v1  ;;  %v1378_v3 = vld [vmem:[%s1732_s1] ss:$8 sps:$4 sm:$0xff]   ;;  %v1379_v4 = vld [vmem:[%s1732_s1 + $0x14] ss:$8 sps:$4 sm:$0xff]   ;;  %v1381_v5 = vld [vmem:[%s1732_s1 + $0x10] ss:$8 sps:$4 sm:$0xff]  }
  0x14   :  { %112 = vmatprep.subr.bf16.mxu0 %v1376_v2  ;;  %v1382_v6 = vld [vmem:[%s1732_s1 + $0x24] ss:$8 sps:$4 sm:$0xff]   ;;  %v1384_v7 = vld [vmem:[%s1732_s1 + $0x20] ss:$8 sps:$4 sm:$0xff]   ;;  %v1385_v9 = vld [vmem:[%s1732_s1 + $0x34] ss:$8 sps:$4 sm:$0xff]  }
  0x15   :  { %113 = vmatpush1.bf16.msra.mxu0 %v1378_v3  ;;  %v1389_v8 = vld [vmem:[%s1734_s3] sm:$0xff]   ;;  %v1390_v10 = vld [vmem:[%s1734_s3 + $0x8] sm:$0xff]   ;;  %v1387_v11 = vld [vmem:[%s1732_s1 + $0x30] ss:$8 sps:$4 sm:$0xff]   ;;  %vm108_vm0 = vcmask 523264   ;;  %vm1490_vm1 = vmmov 0  }
  0x16   :  { %114 = vmatprep.subr.bf16.mxu0 %v1379_v4  ;;  %1351 = vmatpush3.bf16.msra.mxu1 %v1389_v8  ;;  %v1388_v12 = vld [vmem:[%s1731_s0] sm:$0xff]   ;;  %v1391_v13 = vld [vmem:[%s1734_s3 + $0x10] sm:$0xff]   ;;  %v1392_v14 = vld [vmem:[%s1734_s3 + $0x18] sm:$0xff]   ;;  %v1594_v31 = vshrl.u32 %v53_v30, 7 }
  0x17   :  { %1352 = vmatprep.subr.bf16.mxu1 %v1489_v1  ;;  %v1393_v15 = vld [vmem:[%s1734_s3 + $0x20] sm:$0xff]   ;;  %v1394_v16 = vld [vmem:[%s1734_s3 + $0x28] sm:$0xff]   ;;  %v1395_v17 = vld [vmem:[%s1734_s3 + $0x30] sm:$0xff]   ;;  %1366 = vmatprep.mubr.msk.bf16.mxu1 %vm1490_vm1, %v1489_v1 }
  0x18   :  { %v1396_v18 = vld [vmem:[%s1734_s3 + $0x38] sm:$0xff]   ;;  %v1397_v19 = vld [vmem:[#allocation2 + $0xc0] sm:$0xff]   ;;  %v1402_v22 = vld [vmem:[#allocation2 + $0x48] sm:$0xff]   ;;  %v55_v32 = vsub.s32 0, %v1594_v31  ;;  %v274_v3 = vadd.s32 8, %v1594_v31  ;;  %v1609_v4 = vand.u32 7, %v1594_v31 }
  0x19   :  { %115 = vmatpush1.bf16.msra.mxu0 %v1381_v5  ;;  %v1398_v20 = vld [vmem:[#allocation2 + $0x40] sm:$0xff]   ;;  %v1404_v23 = vld [vmem:[#allocation2 + $0x8] sm:$0xff]   ;;  %v1406_v24 = vld [vmem:[#allocation2 + $0x50] sm:$0xff]   ;;  %vm320_vm2 = vcmp.lt.s32.totalorder %v1594_v31, 2  ;;  %vm339_vm3 = vcmp.lt.s32.totalorder %v1594_v31, 1  ;;  %vm301_vm4 = vcmp.lt.s32.totalorder %v1594_v31, 3 }
  0x1a   :  { %116 = vmatprep.subr.bf16.mxu0 %v1382_v6  ;;  %1353 = vmatpush3.bf16.msra.mxu1 %v1390_v10  ;;  %v1400_v21 = vld [vmem:[#allocation2] sm:$0xff]   ;;  %v1408_v25 = vld [vmem:[#allocation2 + $0x10] sm:$0xff]   ;;  %v1410_v26 = vld [vmem:[#allocation2 + $0x58] sm:$0xff]   ;;  %v1611_v5 = vand.u32 7, %v274_v3  ;;  %v323_v6 = vadd.s32 4294967294, %v1609_v4  ;;  %v342_v8 = vadd.s32 4294967295, %v1609_v4 }
  0x1b   :  { %1354 = vmatprep.subr.bf16.mxu1 %v1489_v1  ;;  %v1412_v27 = vld [vmem:[#allocation2 + $0x18] sm:$0xff]   ;;  %v1414_v28 = vld [vmem:[#allocation2 + $0x60] sm:$0xff]   ;;  %v1401_v45 = vld [vmem:[#allocation2 + $0xc8] sm:$0xff]   ;;  %vm389_vm12 = vcmp.lt.s32.totalorder %v1594_v31, 6  ;;  %vm408_vm14 = vcmp.lt.s32.totalorder %v1594_v31, 5 }
  0x1c   :  { %v1416_v29 = vld [vmem:[#allocation2 + $0x20] sm:$0xff]   ;;  %v1403_v46 = vld [vmem:[#allocation2 + $0x88] sm:$0xff]   ;;  %v1405_v47 = vld [vmem:[#allocation2 + $0xd0] sm:$0xff]   ;;  %v343_v10 = vadd.s32 4294967295, %v1611_v5  ;;  %vm325_vm6 = vcmp.ge.s32.totalorder %v323_v6, 0  ;;  %vm344_vm8 = vcmp.ge.s32.totalorder %v342_v8, 0 }
  0x1d   :  { %117 = vmatpush1.bf16.msra.mxu0 %v1384_v7  ;;  %v1600_v33 = vld [vmem:[%s1733_s2] sm:$0x3]  ;;  %v1407_v48 = vld [vmem:[#allocation2 + $0x90] sm:$0xff]   ;;  %v1409_v49 = vld [vmem:[#allocation2 + $0xd8] sm:$0xff]   ;;  %v324_v7 = vadd.s32 4294967294, %v1611_v5 }
  0x1e   :  { %118 = vmatprep.subr.bf16.mxu0 %v1385_v9  ;;  %1355 = vmatpush3.bf16.msra.mxu1 %v1391_v13  ;;  %v56_v34 = vrot.slane %v1600_v33, %v55_v32  ;;  %v1399_v43 = vld [vmem:[#allocation2 + $0x80] sm:$0xff]   ;;  %v1411_v50 = vld [vmem:[#allocation2 + $0x98] sm:$0xff]   ;;  %v1417_v53 = vld [vmem:[#allocation2 + $0xe8] sm:$0xff]   ;;  %v430_v13 = vadd.s32 4, %v1609_v4  ;;  %vm345_vm9 = vcmp.ge.s32.totalorder %v343_v10, 0 }
  0x1f   :  { %1356 = vmatprep.subr.bf16.mxu1 %v1489_v1  ;;  %v1413_v51 = vld [vmem:[#allocation2 + $0xe0] sm:$0xff]   ;;  %v1418_v54 = vld [vmem:[#allocation2 + $0x68] sm:$0xff]   ;;  %v1421_v57 = vld [vmem:[#allocation2 + $0xf0] sm:$0xff]   ;;  %vm326_vm7 = vcmp.ge.s32.totalorder %v324_v7, 0 }
  0x20   :  { %v1415_v52 = vld [vmem:[#allocation2 + $0xa0] sm:$0xff]   ;;  %v1419_v55 = vld [vmem:[#allocation2 + $0xa8] sm:$0xff]   ;;  %v1422_v58 = vld [vmem:[#allocation2 + $0x70] sm:$0xff]   ;;  %vm434_vm13 = vcmp.lt.s32.totalorder %v430_v13, 8 }
  0x21   :  { %119 = vmatpush1.bf16.msra.mxu0 %v1387_v11  ;;  %v1420_v56 = vld [vmem:[#allocation2 + $0x28] sm:$0xff]   ;;  %v1423_v59 = vld [vmem:[#allocation2 + $0xb0] sm:$0xff]   ;;  %v1425_v61 = vld [vmem:[#allocation2 + $0xf8] sm:$0xff]   ;;  %v304_v11 = vadd.s32 4294967293, %v1609_v4 }
  0x22   :  { %1357 = vmatpush3.bf16.msra.mxu1 %v1392_v14  ;;  %1262 = vmatprep.subr.bf16.mxu0 %v1398_v20  ;;  %v1424_v60 = vld [vmem:[#allocation2 + $0x30] sm:$0xff]   ;;  %v1426_v62 = vld [vmem:[#allocation2 + $0x78] sm:$0xff]   ;;  %v1430_v2 = vld [vmem:[#allocation2 + $0x140] sm:$0xff]  }
  0x23   :  { %1358 = vmatprep.subr.bf16.mxu1 %v1489_v1  ;;  %v1427_v63 = vld [vmem:[#allocation2 + $0xb8] sm:$0xff]   ;;  %v1158_v9 = vld [vmem:[%s1735_s4] ss:$0 sm:$0xff]  ;;  %vm306_vm10 = vcmp.ge.s32.totalorder %v304_v11, 0  ;;  %vm1645_vm5 = vmpackc.low %vm326_vm7, %vm325_vm6 }
  0x24   :  { %1157 = vmatmul.mubr.msk.bf16.vlgmr.msra.gmra.mrb[0].mxu0 %vm108_vm0, %v1388_v12  ;;  %v1428_v0 = vld [vmem:[#allocation2 + $0x38] sm:$0xff]   ;;  %v305_v12 = vadd.s32 4294967293, %v1611_v5  ;;  %vm1238_vm6 = vmpackc.low %vm345_vm9, %vm344_vm8  ;;  %v1435_v3 = vld [vmem:[#allocation2 + $0x188] sm:$0xff]  }
  0x25   :  { %1263 = vmatpush3.bf16.msra.mxu0 %v1400_v21  ;;  %v1436_v8 = vld [vmem:[#allocation2 + $0x108] sm:$0xff]  }
  0x26   :  { %1359 = vmatpush3.bf16.msra.mxu1 %v1393_v15  ;;  %1264 = vmatprep.subr.bf16.mxu0 %v1402_v22  ;;  %v431_v15 = vadd.s32 4, %v1611_v5  ;;  %vm307_vm11 = vcmp.ge.s32.totalorder %v305_v12, 0  ;;  %v1438_v12 = vld [vmem:[#allocation2 + $0x150] sm:$0xff]  }
  0x27   :  { %1360 = vmatprep.subr.bf16.mxu1 %v1489_v1 }
  0x28   :  { %vm435_vm15 = vcmp.lt.s32.totalorder %v431_v15, 8  ;;  %v1440_v15 = vld [vmem:[#allocation2 + $0x110] sm:$0xff]  }
  0x29   :  { %1265 = vmatpush3.bf16.msra.mxu0 %v1404_v23  ;;  %vm1675_vm8 = vmpackc.low %vm435_vm15, %vm434_vm13 }
  0x2a   :  { %1361 = vmatpush3.bf16.msra.mxu1 %v1394_v16  ;;  %1266 = vmatprep.subr.bf16.mxu0 %v1406_v24  ;;  %v392_v16 = vadd.s32 2, %v1609_v4 }
  0x2b   :  { %1362 = vmatprep.subr.bf16.mxu1 %v1489_v1 }
  0x2c   :  { %vm396_vm0 = vcmp.lt.s32.totalorder %v392_v16, 8  ;;  %v1441_v16 = vld [vmem:[#allocation2 + $0x1d8] sm:$0xff]  }
  0x2d   :  { %1267 = vmatpush3.bf16.msra.mxu0 %v1408_v25 }
  0x2e   :  { %1363 = vmatpush3.bf16.msra.mxu1 %v1395_v17  ;;  %1268 = vmatprep.subr.bf16.mxu0 %v1410_v26  ;;  %v393_v17 = vadd.s32 2, %v1611_v5 }
  0x2f   :  { %1364 = vmatprep.subr.bf16.mxu1 %v1489_v1  ;;  %v1429_v1 = vld [vmem:[#allocation2 + $0x1c0] sm:$0xff]  }
  0x30   :  { %vm397_vm1 = vcmp.lt.s32.totalorder %v393_v17, 8  ;;  %v1442_v17 = vld [vmem:[#allocation2 + $0x158] sm:$0xff]  }
  0x31   :  { %1269 = vmatpush3.bf16.msra.mxu0 %v1412_v27 }
  0x32   :  { %1365 = vmatpush3.bf16.msra.mxu1 %v1396_v18  ;;  %1270 = vmatprep.subr.bf16.mxu0 %v1414_v28 }
  0x33   :  { %1284 = vmatprep.subr.bf16.mxu1 %v1397_v19 }
  0x35   :  { %1271 = vmatpush3.bf16.msra.mxu0 %v1416_v29 }
  0x36   :  { %1272 = vmatprep.subr.bf16.mxu0 %v1418_v54 }
  0x39   :  { %1273 = vmatpush3.bf16.msra.mxu0 %v1420_v56 }
  0x3a   :  { %1274 = vmatprep.subr.bf16.mxu0 %v1422_v58 }
  0x3d   :  { %1275 = vmatpush3.bf16.msra.mxu0 %v1424_v60 }
  0x3e   :  { %1276 = vmatprep.subr.bf16.mxu0 %v1426_v62 }
  0x41   :  { %1277 = vmatpush3.bf16.msra.mxu0 %v1428_v0  ;;  %v1434_v0 = vld [vmem:[#allocation2 + $0x148] sm:$0xff]  }
  0x42   :  { %1306 = vmatprep.subr.bf16.mxu0 %v1430_v2 }
  0xf7   :  { %v146_v35 = vpop.f32.mrb[0].mxu0 }
  0xf8   :  { %v147_v36 = vadd.f32 %v146_v35, %v56_v34  ;;  %v1603_v37 = vpop.f32.mrb[1].mxu0 }
  0xf9   :  { %v150_v38 = vpop.f32.mrb[2].mxu0 }
  0xfa   :  { %v151_v39 = vadd.f32 %v150_v38, %v56_v34  ;;  %v1605_v40 = vpop.f32.mrb[3].mxu0  ;;  %v155_v41 = vmax.f32 %v147_v36, 0.0 }
  0xfc   :  { %v156_v42 = vmax.f32 %v151_v39, 0.0  ;;  %v373_v39 = vadd.s32 1, %v1609_v4 }
  0xfe   :  { %v157_v44 = vpack.c.bf16 %v156_v42, %v155_v41 }
 0x100   :  { %1367 = vmatmul.mubr.bf16.vlgmr.msra.gmra.mrb[0].mxu1 %v157_v44 }
 0x101   :  { %1285 = vmatpush3.bf16.msra.mxu1 %v1399_v43 }
 0x102   :  { %1286 = vmatprep.subr.bf16.mxu1 %v1401_v45 }
 0x105   :  { %1287 = vmatpush3.bf16.msra.mxu1 %v1403_v46 }
 0x106   :  { %1288 = vmatprep.subr.bf16.mxu1 %v1405_v47 }
 0x109   :  { %1289 = vmatpush3.bf16.msra.mxu1 %v1407_v48 }
 0x10a   :  { %1290 = vmatprep.subr.bf16.mxu1 %v1409_v49  ;;  %v1431_v49 = vld [vmem:[#allocation2 + $0x180] sm:$0xff]  }
 0x10d   :  { %1291 = vmatpush3.bf16.msra.mxu1 %v1411_v50 }
 0x10e   :  { %1292 = vmatprep.subr.bf16.mxu1 %v1413_v51 }
 0x111   :  { %1293 = vmatpush3.bf16.msra.mxu1 %v1415_v52 }
 0x112   :  { %1294 = vmatprep.subr.bf16.mxu1 %v1417_v53 }
 0x115   :  { %1295 = vmatpush3.bf16.msra.mxu1 %v1419_v55  ;;  %v1432_v55 = vld [vmem:[#allocation2 + $0x100] sm:$0xff]  }
 0x116   :  { %1296 = vmatprep.subr.bf16.mxu1 %v1421_v57 }
 0x119   :  { %1297 = vmatpush3.bf16.msra.mxu1 %v1423_v59 }
 0x11a   :  { %1298 = vmatprep.subr.bf16.mxu1 %v1425_v61  ;;  %v1433_v61 = vld [vmem:[#allocation2 + $0x1c8] sm:$0xff]  }
 0x11d   :  { %1299 = vmatpush3.bf16.msra.mxu1 %v1427_v63 }
 0x11e   :  { %1328 = vmatprep.subr.bf16.mxu1 %v1429_v1 }
 0x1d3   :  { %v263_v14 = vpop.f32.mrb[0].mxu1 }
 0x1d4   :  { %v264_v18 = vadd.f32 %v1158_v9, %v263_v14  ;;  %v1368_v19 = vpop.f32.mrb[1].mxu1  ;;  %v1439_v14 = vld [vmem:[#allocation2 + $0x190] sm:$0xff]  }
 0x1d5   :  { %v266_v20 = vpop.f32.mrb[2].mxu1  ;;  %v1444_v19 = vld [vmem:[#allocation2 + $0x118] sm:$0xff]  }
 0x1d6   :  { %v1631_v21 = vmax.f32 %v264_v18, 0.0  ;;  %v267_v22 = vadd.f32 %v1158_v9, %v266_v20  ;;  %v1369_v23 = vpop.f32.mrb[3].mxu1  ;;  %v1437_v9 = vld [vmem:[#allocation2 + $0x1d0] sm:$0xff]   ;;  %v1443_v18 = vld [vmem:[#allocation2 + $0x198] sm:$0xff]   ;;  %v1445_v20 = vld [vmem:[#allocation2 + $0x1e0] sm:$0xff]  }
 0x1d7   :  { %v1448_v23 = vld [vmem:[#allocation2 + $0x120] sm:$0xff]  }
 0x1d8   :  { %v271_v24 = vmax.f32 %v267_v22, 0.0  ;;  %v318_v25 = vrot.slane %v1631_v21, 6  ;;  %v337_v26 = vrot.slane %v1631_v21, 7  ;;  %v299_v27 = vrot.slane %v1631_v21, 5  ;;  %v1447_v22 = vld [vmem:[#allocation2 + $0x1a0] sm:$0xff]  }
 0x1d9   :  { %v425_v28 = vrot.slane %v1631_v21, 4  ;;  %v387_v29 = vrot.slane %v1631_v21, 2  ;;  %v406_v30 = vrot.slane %v1631_v21, 3  ;;  %v368_v32 = vrot.slane %v1631_v21, 1 }
 0x1da   :  { %v447_v34 = vpack.c.bf16 %v271_v24, %v1631_v21  ;;  %v319_v35 = vrot.slane %v271_v24, 6  ;;  %v338_v36 = vrot.slane %v271_v24, 7  ;;  %v300_v38 = vrot.slane %v271_v24, 5  ;;  %v1446_v21 = vld [vmem:[#allocation2 + $0x160] sm:$0xff]  }
 0x1db   :  { %v426_v41 = vrot.slane %v271_v24, 4  ;;  %v388_v42 = vrot.slane %v271_v24, 2  ;;  %v407_v43 = vrot.slane %v271_v24, 3  ;;  %v369_v44 = vrot.slane %v271_v24, 1  ;;  %v1449_v24 = vld [vmem:[#allocation2 + $0x1e8] sm:$0xff]  }
 0x1dc   :  { %1044 = vmatprep.mubr.bf16.mxu1 %v447_v34  ;;  %v321_v45 = vsel %vm320_vm2, %v318_v25, %v319_v35  ;;  %v322_v46 = vsel %vm320_vm2, %v319_v35, %v318_v25  ;;  %v340_v47 = vsel %vm339_vm3, %v337_v26, %v338_v36  ;;  %v341_v48 = vsel %vm339_vm3, %v338_v36, %v337_v26  ;;  %vm1665_vm2 = vmpackc.low %vm307_vm11, %vm306_vm10  ;;  %v1450_v25 = vld [vmem:[#allocation2 + $0x168] sm:$0xff]   ;;  %v1457_v34 = vld [vmem:[#allocation2 + $0x1f8] sm:$0xff]  }
 0x1dd   :  { %v1233_v50 = vpack.c.bf16 %v321_v45, %v322_v46  ;;  %v1239_v51 = vpack.c.bf16 %v340_v47, %v341_v48  ;;  %v302_v52 = vsel %vm301_vm4, %v299_v27, %v300_v38  ;;  %v303_v53 = vsel %vm301_vm4, %v300_v38, %v299_v27  ;;  %vm1241_vm4 = vmpackc.low %vm397_vm1, %vm396_vm0  ;;  %v1451_v26 = vld [vmem:[#allocation2 + $0x1a8] sm:$0xff]   ;;  %v1458_v38 = vld [vmem:[#allocation2 + $0x178] sm:$0xff]  }
 0x1de   :  { %v1236_v56 = vpack.c.bf16 %v302_v52, %v303_v53  ;;  %vm1743_vm3 = vcmp.lt.s32.totalorder %v1594_v31, 4  ;;  %v390_v60 = vsel %vm389_vm12, %v387_v29, %v388_v42  ;;  %v391_v63 = vsel %vm389_vm12, %v388_v42, %v387_v29  ;;  %v1452_v27 = vld [vmem:[#allocation2 + $0x128] sm:$0xff]   ;;  %v1454_v29 = vld [vmem:[#allocation2 + $0x170] sm:$0xff]   ;;  %v1459_v42 = vld [vmem:[#allocation2 + $0x1b8] sm:$0xff]  }
 0x1df   :  { %v428_v57 = vsel %vm1743_vm3, %v425_v28, %v426_v41  ;;  %vm1744_vm7 = vmmov %vm1743_vm3  ;;  %1234 = vmatprep.mubr.msk.bf16.mxu0 %vm1645_vm5, %v1233_v50  ;;  %1240 = vmatmul.mubr.msk.bf16.vlgmr.msra.gmra.mrb[4].mxu1 %vm1238_vm6, %v1239_v51  ;;  %v1689_v1 = vsel %vm408_vm14, %v406_v30, %v407_v43  ;;  %v1242_v2 = vpack.c.bf16 %v391_v63, %v390_v60  ;;  %vm1747_vm5 = vcmp.lt.s32.totalorder %v1594_v31, 7  ;;  %v1167_v46 = vld [vmem:[%s1737_s6] ss:$0 sm:$0xff] }
 0x1e0   :  { %v429_v58 = vsel %vm1744_vm7, %v426_v41, %v425_v28  ;;  %1329 = vmatpush3.bf16.msra.mxu1 %v1431_v49  ;;  %1237 = vmatmul.mubr.msk.bf16.vlgmr.msra.gmra.mrb[4].mxu0 %vm1665_vm2, %v1236_v56  ;;  %v1695_v6 = vsel %vm408_vm14, %v407_v43, %v406_v30  ;;  %v1699_v7 = vsel %vm1747_vm5, %v368_v32, %v369_v44  ;;  %vm1748_vm9 = vmmov %vm1747_vm5  ;;  %v1453_v28 = vld [vmem:[#allocation2 + $0x1f0] sm:$0xff]   ;;  %v411_v35 = vadd.s32 3, %v1609_v4  ;;  %v1460_v43 = vld [vmem:[#allocation2 + $0x138] sm:$0xff]  }
 0x1e1   :  { %v1248_v62 = vpack.c.bf16 %v429_v58, %v428_v57  ;;  %1307 = vmatpush3.bf16.msra.mxu0 %v1432_v55  ;;  %v1251_v10 = vpack.c.bf16 %v1695_v6, %v1689_v1  ;;  %v1707_v11 = vsel %vm1748_vm9, %v369_v44, %v368_v32  ;;  %1243 = vmatprep.mubr.msk.bf16.mxu0 %vm1241_vm4, %v1242_v2  ;;  %v1455_v30 = vld [vmem:[#allocation2 + $0x1b0] sm:$0xff]   ;;  %v412_v36 = vadd.s32 3, %v1611_v5 }
 0x1e2   :  { %1330 = vmatprep.subr.bf16.mxu1 %v1433_v61  ;;  %v1245_v13 = vpack.c.bf16 %v1707_v11, %v1699_v7  ;;  %1308 = vmatprep.subr.bf16.mxu0 %v1434_v0  ;;  %v1456_v32 = vld [vmem:[#allocation2 + $0x130] sm:$0xff]   ;;  %v374_v41 = vadd.s32 1, %v1611_v5  ;;  %vm415_vm10 = vcmp.lt.s32.totalorder %v411_v35, 8  ;;  %vm377_vm12 = vcmp.lt.s32.totalorder %v373_v39, 8 }
 0x1e3   :  { %1249 = vmatprep.mubr.msk.bf16.mxu1 %vm1675_vm8, %v1248_v62  ;;  %vm416_vm11 = vcmp.lt.s32.totalorder %v412_v36, 8  ;;  %v59_v60 = vsub.s32 1, %v1594_v31 }
 0x1e4   :  { %1331 = vmatpush3.bf16.msra.mxu1 %v1435_v3  ;;  %vm378_vm13 = vcmp.lt.s32.totalorder %v374_v41, 8  ;;  %vm1250_vm14 = vmpackc.low %vm416_vm11, %vm415_vm10 }
 0x1e5   :  { %1309 = vmatpush3.bf16.msra.mxu0 %v1436_v8  ;;  %1332 = vmatprep.subr.bf16.mxu1 %v1437_v9  ;;  %vm1244_vm15 = vmpackc.low %vm378_vm13, %vm377_vm12  ;;  %v60_v9 = vrot.slane %v1600_v33, %v59_v60 }
 0x1e6   :  { %1310 = vmatprep.subr.bf16.mxu0 %v1438_v12 }
 0x1e8   :  { %1333 = vmatpush3.bf16.msra.mxu1 %v1439_v14  ;;  %v149_v14 = vadd.f32 %v1603_v37, %v60_v9 }
 0x1e9   :  { %1311 = vmatpush3.bf16.msra.mxu0 %v1440_v15  ;;  %1334 = vmatprep.subr.bf16.mxu1 %v1441_v16  ;;  %v153_v16 = vadd.f32 %v1605_v40, %v60_v9 }
 0x1ea   :  { %1312 = vmatprep.subr.bf16.mxu0 %v1442_v17 }
 0x1ec   :  { %1335 = vmatpush3.bf16.msra.mxu1 %v1443_v18 }
 0x1ed   :  { %1313 = vmatpush3.bf16.msra.mxu0 %v1444_v19  ;;  %1336 = vmatprep.subr.bf16.mxu1 %v1445_v20 }
 0x1ee   :  { %1314 = vmatprep.subr.bf16.mxu0 %v1446_v21 }
 0x1f0   :  { %1337 = vmatpush3.bf16.msra.mxu1 %v1447_v22 }
 0x1f1   :  { %1315 = vmatpush3.bf16.msra.mxu0 %v1448_v23  ;;  %1338 = vmatprep.subr.bf16.mxu1 %v1449_v24 }
 0x1f2   :  { %1316 = vmatprep.subr.bf16.mxu0 %v1450_v25 }
 0x1f4   :  { %1339 = vmatpush3.bf16.msra.mxu1 %v1451_v26 }
 0x1f5   :  { %1317 = vmatpush3.bf16.msra.mxu0 %v1452_v27  ;;  %1340 = vmatprep.subr.bf16.mxu1 %v1453_v28 }
 0x1f6   :  { %1318 = vmatprep.subr.bf16.mxu0 %v1454_v29 }
 0x1f8   :  { %1341 = vmatpush3.bf16.msra.mxu1 %v1455_v30 }
 0x1f9   :  { %1319 = vmatpush3.bf16.msra.mxu0 %v1456_v32  ;;  %1342 = vmatprep.subr.bf16.mxu1 %v1457_v34 }
 0x1fa   :  { %1320 = vmatprep.subr.bf16.mxu0 %v1458_v38 }
 0x1fc   :  { %1343 = vmatpush3.bf16.msra.mxu1 %v1459_v42 }
 0x1fd   :  { %1321 = vmatpush3.bf16.msra.mxu0 %v1460_v43 }
 0x1ff   :  { %1252 = vmatmul.mubr.msk.bf16.vlgmr.msra.gmra.mrb[8].mxu1 %vm1250_vm14, %v1251_v10 }
 0x200   :  { %1246 = vmatmul.mubr.msk.bf16.vlgmr.msra.gmra.mrb[8].mxu0 %vm1244_vm15, %v1245_v13 }
 0x2b2   :  { %v1300_v4 = vpop.f32.mrb[4].mxu1 }
 0x2b3   :  { %v1278_v5 = vpop.f32.mrb[4].mxu0  ;;  %v1301_v44 = vpop.f32.mrb[5].mxu1 }
 0x2b4   :  { %v1302_v45 = vadd.f32 %v1301_v44, %v1300_v4  ;;  %v1279_v47 = vpop.f32.mrb[5].mxu0  ;;  %v1303_v48 = vpop.f32.mrb[6].mxu1 }
 0x2b5   :  { %v1280_v49 = vadd.f32 %v1279_v47, %v1278_v5  ;;  %v1281_v50 = vpop.f32.mrb[6].mxu0  ;;  %v1304_v51 = vpop.f32.mrb[7].mxu1 }
 0x2b6   :  { %v1305_v52 = vadd.f32 %v1304_v51, %v1303_v48  ;;  %v1282_v53 = vpop.f32.mrb[7].mxu0 }
 0x2b7   :  { %v1006_v54 = vadd.f32 %v1280_v49, %v1167_v46  ;;  %v1283_v55 = vadd.f32 %v1282_v53, %v1281_v50 }
 0x2b9   :  { %v1009_v56 = vadd.f32 %v1283_v55, %v1167_v46  ;;  %v1047_v57 = vadd.f32 %v1302_v45, %v1006_v54 }
 0x2bb   :  { %v1050_v58 = vadd.f32 %v1305_v52, %v1009_v56 }
 0x2d2   :  { %v1344_v59 = vpop.f32.mrb[8].mxu1 }
 0x2d3   :  { %v1322_v61 = vpop.f32.mrb[8].mxu0  ;;  %v1345_v62 = vpop.f32.mrb[9].mxu1 }
 0x2d4   :  { %v1346_v63 = vadd.f32 %v1345_v62, %v1344_v59  ;;  %v1323_v0 = vpop.f32.mrb[9].mxu0  ;;  %v1347_v1 = vpop.f32.mrb[10].mxu1 }
 0x2d5   :  { %v1324_v2 = vadd.f32 %v1323_v0, %v1322_v61  ;;  %v1325_v3 = vpop.f32.mrb[10].mxu0  ;;  %v1348_v6 = vpop.f32.mrb[11].mxu1 }
 0x2d6   :  { %v1349_v7 = vadd.f32 %v1348_v6, %v1347_v1  ;;  %v1326_v8 = vpop.f32.mrb[11].mxu0 }
 0x2d7   :  { %v1088_v10 = vadd.f32 %v1324_v2, %v1047_v57  ;;  %v1327_v11 = vadd.f32 %v1326_v8, %v1325_v3 }
 0x2d9   :  { %v1129_v12 = vadd.f32 %v1346_v63, %v1088_v10  ;;  %v1091_v13 = vadd.f32 %v1327_v11, %v1050_v58 }
 0x2db   :  { %v1135_v15 = vmax.f32 %v1129_v12, 0.0  ;;  %v1132_v31 = vadd.f32 %v1349_v7, %v1091_v13 }
 0x2dd   :  { %v1137_v17 = vadd.f32 %v1135_v15, %v149_v14  ;;  %v1136_v18 = vmax.f32 %v1132_v31, 0.0 }
 0x2df   :  { %v1139_v19 = vmax.f32 %v1137_v17, 0.0  ;;  %v1138_v20 = vadd.f32 %v1136_v18, %v153_v16 }
 0x2e1   :  { %1141 = vst [vmem:[%s1738_s7] sm:$0xff] %v1139_v19  ;;  %v1140_v21 = vmax.f32 %v1138_v20, 0.0 }
 0x2e3   :  { %1142 = vst [vmem:[%s1738_s7 + $0x8] sm:$0xff] %v1140_v21 }
 0x2e4   :  { %1147 = vsyncpa [#allocation3], 1 }

</bundles_post_ra>
